<compile_context>
chip_gen: v6e
topology: v6e:2x2x1
jax: 0.10.0
libtpu: 0.0.40
codegen_flags: <defaults>
</compile_context>

<pallas_src>
import jax
import jax.numpy as jnp
from jax.experimental import pallas as pl
from jax.experimental.pallas import tpu as pltpu


def _ffn_kernel(x_ref, w1_ref, b1_ref, w2_ref, b2_ref, o_ref, acc_ref):
    k = pl.program_id(1)

    @pl.when(k == 0)
    def _init():
        # Fold the second bias into the accumulator init.
        acc_ref[...] = jnp.broadcast_to(
            b2_ref[...].astype(jnp.float32), acc_ref.shape)

    # First linear (d_ff chunk): [tm, d_model] @ [d_model, tf] + b1[tf]; ReLU.
    h = jnp.dot(x_ref[...], w1_ref[...], preferred_element_type=jnp.float32)
    h = jnp.maximum(h + b1_ref[...].astype(jnp.float32), 0.0)
    # (dropout = identity in eval mode)

    # Second linear (same d_ff chunk), accumulated over the reduction axis.
    acc_ref[...] += jnp.dot(h.astype(w2_ref.dtype), w2_ref[...],
                            preferred_element_type=jnp.float32)

    @pl.when(k == pl.num_programs(1) - 1)
    def _finalize():
        o_ref[...] = acc_ref[...].astype(o_ref.dtype)


def _round_up(x, m):
    return ((x + m - 1) // m) * m


def positionwise_feed_forward(x, w1, b1, w2, b2, *, tm=256, tf=512):
    """x: [..., d_model]; w1: [d_model, d_ff]; b1: [d_ff];
    w2: [d_ff, d_model]; b2: [d_model]."""
    orig_shape = x.shape
    d_model = orig_shape[-1]
    d_ff = w1.shape[1]

    x2d = x.reshape(-1, d_model)                       # [T, d_model]
    T = x2d.shape[0]

    # Row tile: fixed size (default 256), multiple of 8, not larger than the
    # padded token count. Pad T so no trailing rows are dropped.
    tm = min(tm, _round_up(T, 8))
    tm = _round_up(tm, 8)
    T_pad = _round_up(T, tm)
    if T_pad != T:
        x2d = jnp.pad(x2d, ((0, T_pad - T), (0, 0)))

    # d_ff tile: lane-aligned (multiple of 128) and must divide d_ff exactly;
    # otherwise fall back to the full d_ff (small models).
    if d_ff % tf != 0 or tf % 128 != 0:
        tf = d_ff
    n_k = d_ff // tf

    b1_2d = b1.reshape(1, d_ff)
    b2_2d = b2.reshape(1, d_model)

    itemsize = jnp.dtype(x.dtype).itemsize
    cost = pl.CostEstimate(
        flops=4 * T_pad * d_model * d_ff,              # two matmuls
        transcendentals=0,
        bytes_accessed=(2 * T_pad * d_model            # x + out
                        + 2 * d_model * d_ff           # W1 + W2
                        + d_ff + d_model) * itemsize,  # biases
    )

    out2d = pl.pallas_call(
        _ffn_kernel,
        out_shape=jax.ShapeDtypeStruct((T_pad, d_model), x.dtype),
        grid_spec=pltpu.PrefetchScalarGridSpec(
            num_scalar_prefetch=0,
            grid=(T_pad // tm, n_k),
            in_specs=[
                pl.BlockSpec((tm, d_model), lambda i, k: (i, 0)),   # x tile
                pl.BlockSpec((d_model, tf), lambda i, k: (0, k)),   # W1 chunk
                pl.BlockSpec((1, tf), lambda i, k: (0, k)),         # b1 chunk
                pl.BlockSpec((tf, d_model), lambda i, k: (k, 0)),   # W2 chunk
                pl.BlockSpec((1, d_model), lambda i, k: (0, 0)),    # b2
            ],
            out_specs=pl.BlockSpec((tm, d_model), lambda i, k: (i, 0)),
            scratch_shapes=[pltpu.VMEM((tm, d_model), jnp.float32)],
        ),
        compiler_params=pltpu.CompilerParams(
            dimension_semantics=("parallel", "arbitrary")),
        cost_estimate=cost,
    )(x2d, w1, b1_2d, w2, b2_2d)

    if T_pad != T:
        out2d = out2d[:T]
    return out2d.reshape(orig_shape)


if __name__ == "__main__":
    # Small shapes consistent with the module: batch=2, seq=8, d_model=32, d_ff=64
    batch, seq, d_model, d_ff = 2, 8, 32, 64

    key = jax.random.PRNGKey(0)
    kx, kw1, kb1, kw2, kb2 = jax.random.split(key, 5)

    x = jax.random.normal(kx, (batch, seq, d_model), dtype=jnp.float32)

    # Deterministic init mimicking nn.Linear default U(-1/sqrt(fan_in), 1/sqrt(fan_in)).
    # Stored pre-transposed: W1 is [d_model, d_ff], W2 is [d_ff, d_model].
    bound1 = 1.0 / (d_model ** 0.5)
    w1 = jax.random.uniform(kw1, (d_model, d_ff), jnp.float32, -bound1, bound1)
    b1 = jax.random.uniform(kb1, (d_ff,), jnp.float32, -bound1, bound1)
    bound2 = 1.0 / (d_ff ** 0.5)
    w2 = jax.random.uniform(kw2, (d_ff, d_model), jnp.float32, -bound2, bound2)
    b2 = jax.random.uniform(kb2, (d_model,), jnp.float32, -bound2, bound2)

    out = positionwise_feed_forward(x, w1, b1, w2, b2)
    out = jax.block_until_ready(out)

    ref = jnp.maximum(x @ w1 + b1, 0.0) @ w2 + b2
    assert out.shape == x.shape
    assert jnp.allclose(out, ref, atol=1e-5, rtol=1e-5)

    # Exercise the multi-row-tile + ragged-T path (T=300 not a multiple of tm).
    x2 = jax.random.normal(kw1, (3, 100, d_model), dtype=jnp.float32)
    out2 = jax.block_until_ready(
        positionwise_feed_forward(x2, w1, b1, w2, b2, tm=64))
    ref2 = jnp.maximum(x2 @ w1 + b1, 0.0) @ w2 + b2
    assert jnp.allclose(out2, ref2, atol=1e-4, rtol=1e-4)

    # Exercise the d_ff-tiled accumulation path (grid = (3, 2)).
    dm2, dff2 = 128, 256
    x3 = jax.random.normal(kx, (2, 24, dm2), dtype=jnp.float32)
    w1b = jax.random.uniform(kw1, (dm2, dff2), jnp.float32, -0.05, 0.05)
    b1b = jax.random.uniform(kb1, (dff2,), jnp.float32, -0.05, 0.05)
    w2b = jax.random.uniform(kw2, (dff2, dm2), jnp.float32, -0.05, 0.05)
    b2b = jax.random.uniform(kb2, (dm2,), jnp.float32, -0.05, 0.05)
    out3 = jax.block_until_ready(
        positionwise_feed_forward(x3, w1b, b1b, w2b, b2b, tm=16, tf=128))
    ref3 = jnp.maximum(x3 @ w1b + b1b, 0.0) @ w2b + b2b
    assert jnp.allclose(out3, ref3, atol=1e-4, rtol=1e-4)

    print("KERNEL_OK")
</pallas_src>

<mosaic_0001>
module attributes {stable_mosaic.version = 11 : i64} {
  func.func @_ffn_kernel(%arg0: i32, %arg1: i32, %arg2: memref<16x32xf32, #tpu.memory_space<vmem>>, %arg3: memref<32x64xf32, #tpu.memory_space<vmem>>, %arg4: memref<1x64xf32, #tpu.memory_space<vmem>>, %arg5: memref<64x32xf32, #tpu.memory_space<vmem>>, %arg6: memref<1x32xf32, #tpu.memory_space<vmem>>, %arg7: memref<16x32xf32, #tpu.memory_space<vmem>>, %arg8: memref<16x32xf32, #tpu.memory_space<vmem>>) attributes {dimension_semantics = [#tpu.dimension_semantics<parallel>, #tpu.dimension_semantics<arbitrary>], iteration_bounds = array<i64: 1, 1>, scalar_prefetch = 0 : i64, scratch_operands = 1 : i64, tpu.core_type = #tpu.core_type<tc>, window_params = [{transform_indices = @transform_0, window_bounds = array<i64: 16, 32>}, {transform_indices = @transform_1, window_bounds = array<i64: 32, 64>}, {transform_indices = @transform_2, window_bounds = array<i64: 1, 64>}, {transform_indices = @transform_3, window_bounds = array<i64: 64, 32>}, {pipeline_mode = #tpu.pipeline_mode<synchronous>, transform_indices = @transform_4, window_bounds = array<i64: 1, 32>}, {transform_indices = @transform_5, window_bounds = array<i64: 16, 32>}]} {
    %c0_i32 = arith.constant 0 : i32
    %0 = arith.cmpi eq, %arg1, %c0_i32 : i32
    %1 = arith.extui %0 : i1 to i32
    %c0_i32_0 = arith.constant 0 : i32
    %2 = arith.cmpi ne, %1, %c0_i32_0 : i32
    scf.if %2 {
      %c0_16 = arith.constant 0 : index
      %c0_17 = arith.constant 0 : index
      %19 = vector.load %arg6[%c0_16, %c0_17] : memref<1x32xf32, #tpu.memory_space<vmem>>, vector<1x32xf32>
      %20 = vector.shape_cast %19 : vector<1x32xf32> to vector<1x32xf32>
      %21 = vector.broadcast %20 : vector<1x32xf32> to vector<16x32xf32>
      %c0_18 = arith.constant 0 : index
      %c0_19 = arith.constant 0 : index
      %22 = vector.load %arg8[%c0_18, %c0_19] : memref<16x32xf32, #tpu.memory_space<vmem>>, vector<16x32xf32>
      tpu.vector_store %arg8[%c0_18, %c0_19], %21 {strides = array<i32>} : memref<16x32xf32, #tpu.memory_space<vmem>>, vector<16x32xf32>,
    } else {
    }
    %c0 = arith.constant 0 : index
    %c0_1 = arith.constant 0 : index
    %3 = vector.load %arg2[%c0, %c0_1] : memref<16x32xf32, #tpu.memory_space<vmem>>, vector<16x32xf32>
    %c0_2 = arith.constant 0 : index
    %c0_3 = arith.constant 0 : index
    %4 = vector.load %arg3[%c0_2, %c0_3] : memref<32x64xf32, #tpu.memory_space<vmem>>, vector<32x64xf32>
    %cst = arith.constant dense<0.000000e+00> : vector<16x64xf32>
    %5 = tpu.matmul %3, %4, %cst {dimension_numbers = #tpu.dot_dimension_numbers<[1], [0], [0], [1], [0, 0, 1, 1], [], []>} : vector<16x32xf32>, vector<32x64xf32>, vector<16x64xf32> -> vector<16x64xf32>
    %c0_4 = arith.constant 0 : index
    %c0_5 = arith.constant 0 : index
    %6 = vector.load %arg4[%c0_4, %c0_5] : memref<1x64xf32, #tpu.memory_space<vmem>>, vector<1x64xf32>
    %7 = vector.broadcast %6 : vector<1x64xf32> to vector<16x64xf32>
    %8 = arith.addf %5, %7 : vector<16x64xf32>
    %cst_6 = arith.constant 0.000000e+00 : f32
    %9 = vector.broadcast %cst_6 : f32 to vector<16x64xf32>
    %10 = arith.maximumf %8, %9 : vector<16x64xf32>
    %c0_7 = arith.constant 0 : index
    %c0_8 = arith.constant 0 : index
    %11 = vector.load %arg8[%c0_7, %c0_8] : memref<16x32xf32, #tpu.memory_space<vmem>>, vector<16x32xf32>
    %c0_9 = arith.constant 0 : index
    %c0_10 = arith.constant 0 : index
    %12 = vector.load %arg5[%c0_9, %c0_10] : memref<64x32xf32, #tpu.memory_space<vmem>>, vector<64x32xf32>
    %cst_11 = arith.constant dense<0.000000e+00> : vector<16x32xf32>
    %13 = tpu.matmul %10, %12, %cst_11 {dimension_numbers = #tpu.dot_dimension_numbers<[1], [0], [0], [1], [0, 0, 1, 1], [], []>} : vector<16x64xf32>, vector<64x32xf32>, vector<16x32xf32> -> vector<16x32xf32>
    %14 = arith.addf %11, %13 : vector<16x32xf32>
    %c0_12 = arith.constant 0 : index
    %c0_13 = arith.constant 0 : index
    %15 = vector.load %arg8[%c0_12, %c0_13] : memref<16x32xf32, #tpu.memory_space<vmem>>, vector<16x32xf32>
    tpu.vector_store %arg8[%c0_12, %c0_13], %14 {strides = array<i32>} : memref<16x32xf32, #tpu.memory_space<vmem>>, vector<16x32xf32>,
    %c0_i32_14 = arith.constant 0 : i32
    %16 = arith.cmpi eq, %arg1, %c0_i32_14 : i32
    %17 = arith.extui %16 : i1 to i32
    %c0_i32_15 = arith.constant 0 : i32
    %18 = arith.cmpi ne, %17, %c0_i32_15 : i32
    scf.if %18 {
      %c0_16 = arith.constant 0 : index
      %c0_17 = arith.constant 0 : index
      %19 = vector.load %arg8[%c0_16, %c0_17] : memref<16x32xf32, #tpu.memory_space<vmem>>, vector<16x32xf32>
      %c0_18 = arith.constant 0 : index
      %c0_19 = arith.constant 0 : index
      %20 = vector.load %arg7[%c0_18, %c0_19] : memref<16x32xf32, #tpu.memory_space<vmem>>, vector<16x32xf32>
      tpu.vector_store %arg7[%c0_18, %c0_19], %19 {strides = array<i32>} : memref<16x32xf32, #tpu.memory_space<vmem>>, vector<16x32xf32>,
    } else {
    }
    return
  }
  func.func @transform_0(%arg0: i32, %arg1: i32) -> (i32, i32) {
    %c0_i32 = arith.constant 0 : i32
    %c0_i32_0 = arith.constant 0 : i32
    return %arg0, %c0_i32 : i32, i32
  }
  func.func @transform_1(%arg0: i32, %arg1: i32) -> (i32, i32) {
    %c0_i32 = arith.constant 0 : i32
    %c0_i32_0 = arith.constant 0 : i32
    return %c0_i32, %arg1 : i32, i32
  }
  func.func @transform_2(%arg0: i32, %arg1: i32) -> (i32, i32) {
    %c0_i32 = arith.constant 0 : i32
    %c0_i32_0 = arith.constant 0 : i32
    return %c0_i32, %arg1 : i32, i32
  }
  func.func @transform_3(%arg0: i32, %arg1: i32) -> (i32, i32) {
    %c0_i32 = arith.constant 0 : i32
    %c0_i32_0 = arith.constant 0 : i32
    return %arg1, %c0_i32 : i32, i32
  }
  func.func @transform_4(%arg0: i32, %arg1: i32) -> (i32, i32) {
    %c0_i32 = arith.constant 0 : i32
    %c0_i32_0 = arith.constant 0 : i32
    %c0_i32_1 = arith.constant 0 : i32
    return %c0_i32, %c0_i32_0 : i32, i32
  }
  func.func @transform_5(%arg0: i32, %arg1: i32) -> (i32, i32) {
    %c0_i32 = arith.constant 0 : i32
    %c0_i32_0 = arith.constant 0 : i32
    return %arg0, %c0_i32 : i32, i32
  }
}

</mosaic_0001>

<bundles_post_ra>
// kernel: tpu_custom_call.1
= control target key start
LH: loop header
LB: loop body
LE: loop exit
PB: predicated region body
PF: predicated region fallthrough
CT: control target
= control target key end

     0   :  { %vm32_vm0 = vcmask 261120   ;;  %s420_s0 = inlined_call_operand.vmem [shape: f32[16,32], index: 0, kind: input, shape index: {}]   ;;  %s421_s1 = inlined_call_operand.vmem [shape: f32[32,64], index: 1, kind: input, shape index: {}]   ;;  %s422_s2 = inlined_call_operand.vmem [shape: f32[1,64], index: 2, kind: input, shape index: {}]   ;;  %s423_s3 = inlined_call_operand.vmem [shape: f32[64,32], index: 3, kind: input, shape index: {}]   ;;  %s424_s4 = inlined_call_operand.vmem [shape: f32[1,32], index: 4, kind: input, shape index: {}]   ;;  %s425_s5 = inlined_call_operand.hbm [shape: f32[16,32], index: 5, kind: output, shape index: {}]  }
   0x1   :  { %v40_v0 = vld [vmem:[%s421_s1 + $0x18] sm:$0xff]  ;;  %v39_v1 = vld [vmem:[%s421_s1 + $0x10] sm:$0xff]  ;;  %v35_v2 = vld [vmem:[%s420_s0] sm:$0xff] }
   0x2   :  { %273 = vmatprep.subr.mxu0 %v40_v0  ;;  %v38_v3 = vld [vmem:[%s421_s1 + $0x8] sm:$0xff]  ;;  %281 = vmatprep.mubr.msk.f32.mxu0 %vm32_vm0, %v35_v2  ;;  %v141_v4 = vld [vmem:[%s423_s3 + $0x38] sm:$0xff]  ;;  %v140_v5 = vld [vmem:[%s423_s3 + $0x30] sm:$0xff] }
   0x3   :  { %274 = vmatpush3.msra.mxu0 %v40_v0  ;;  %284 = vmatprep.subr.mxu1 %v141_v4 }
   0x4   :  { %275 = vmatprep.subr.mxu0 %v39_v1 }
   0x5   :  { %10 = vsyncpa [#allocation4], 0  ;;  %276 = vmatpush3.msra.mxu0 %v39_v1  ;;  %v37_v6 = vld [vmem:[%s421_s1] sm:$0xff]  ;;  %285 = vmatpush3.msra.mxu1 %v141_v4  ;;  %v139_v7 = vld [vmem:[%s423_s3 + $0x28] sm:$0xff]  ;;  %vm142_vm1 = vcmask 523264  }
   0x6   :  { %277 = vmatprep.subr.mxu0 %v38_v3  ;;  %286 = vmatprep.subr.mxu1 %v140_v5  ;;  %v36_v8 = vld [vmem:[%s420_s0 + $0x8] sm:$0xff]  ;;  %v138_v9 = vld [vmem:[%s423_s3 + $0x20] sm:$0xff]  ;;  %v137_v10 = vld [vmem:[%s423_s3 + $0x18] sm:$0xff] }
   0x7   :  { %278 = vmatpush3.msra.mxu0 %v38_v3  ;;  %287 = vmatpush3.msra.mxu1 %v140_v5  ;;  %v136_v11 = vld [vmem:[%s423_s3 + $0x10] sm:$0xff]  ;;  %v135_v12 = vld [vmem:[%s423_s3 + $0x8] sm:$0xff]  ;;  %v134_v13 = vld [vmem:[%s423_s3] sm:$0xff] }
   0x8   :  { %279 = vmatprep.subr.mxu0 %v37_v6  ;;  %288 = vmatprep.subr.mxu1 %v139_v7  ;;  %v251_v14 = vld [vmem:[%s424_s4] ss:$0 sm:$0xff] }
   0x9   :  { %280 = vmatpush3.msra.mxu0 %v37_v6  ;;  %289 = vmatpush3.msra.mxu1 %v139_v7  ;;  %34 = vst.msk [vmem:[#allocation2 + $0x8] sm:$0xff] %vm32_vm0, %v251_v14  ;;  %33 = vst.msk [vmem:[#allocation2] sm:$0xff] %vm32_vm0, %v251_v14  ;;  %v252_v15 = vld [vmem:[%s422_s2] ss:$0 sm:$0xff]  ;;  %s328_s2 = smov [#allocation3]  }
   0xa   :  { %282 = vmatmul.mubr.msk.f32.vlgmr.msra.gmra.mxu0 %vm32_vm0, %v36_v8  ;;  %290 = vmatprep.subr.mxu1 %v138_v9  ;;  %s240_s3 = sshll.u32 %s328_s2, 4  ;;  %s241_s3 = int_to_ptr.vmem [resolvable:$true] %s240_s3 }
   0xb   :  { %291 = vmatpush3.msra.mxu1 %v138_v9  ;;  %s306_s4 = scalar_lea.vmem %s241_s3, 256  ;;  %p311_p1 = scmp.lt.s32.totalorder %s241_s3, %s241_s3 }
   0xc   :  { %292 = vmatprep.subr.mxu1 %v137_v10  ;;  %p307_p0 = scmp.ne.s32.totalorder %s241_s3, %s306_s4  ;;  %p312_p2 = scmp.lt.s32.totalorder %s306_s4, %s306_s4 }
   0xd   :  { %293 = vmatpush3.msra.mxu1 %v137_v10 }
   0xe   :  { %294 = vmatprep.subr.mxu1 %v136_v11  ;;  %p313_p3 = por %p312_p2, %p311_p1 }
   0xf   :  { %295 = vmatpush3.msra.mxu1 %v136_v11 }
  0x10   :  { %296 = vmatprep.subr.mxu1 %v135_v12  ;;  %v133_v22 = vld [vmem:[#allocation2 + $0x8] sm:$0xff]  ;;  %v132_v24 = vld [vmem:[#allocation2] sm:$0xff]  ;;  %p314_p4 = pnand %p313_p3, %p307_p0 }
  0x11   :  { %297 = vmatpush3.msra.mxu1 %v135_v12 }
  0x12   :  { %298 = vmatprep.subr.mxu1 %v134_v13 }
  0x13   :  { %299 = vmatpush3.msra.mxu1 %v134_v13 }
  0xca   :  { %v283_v16 = vpop.f32.mrf.mxu0 }
  0xcb   :  { %v127_v17 = vadd.f32 %v283_v16, %v252_v15 }
  0xcc   :  { %v121_v18 = vpop.f32.mrf.mxu0 }
  0xcd   :  { %v122_v19 = vadd.f32 %v252_v15, %v121_v18  ;;  %v131_v21 = vmax.f32 %v127_v17, 0.0 }
  0xcf   :  { %v130_v20 = vmax.f32 %v122_v19, 0.0 }
  0xd1   :  { %300 = vmatprep.mubr.msk.f32.mxu1 %vm142_vm1, %v130_v20 }
  0xd2   :  { %301 = vmatmul.mubr.msk.f32.vlgmr.msra.gmra.mxu1 %vm142_vm1, %v131_v21 }
 0x192   :  { %v302_v23 = vpop.f32.mrf.mxu1 }
 0x193   :  { %v225_v25 = vadd.f32 %v302_v23, %v133_v22 }
 0x194   :  { %v215_v26 = vpop.f32.mrf.mxu1 }
 0x195   :  { %227 = vst.msk [vmem:[#allocation2 + $0x8] sm:$0xff] %vm32_vm0, %v225_v25  ;;  %v224_v27 = vadd.f32 %v215_v26, %v132_v24 }
 0x197   :  { %226 = vst.msk [vmem:[#allocation2] sm:$0xff] %vm32_vm0, %v224_v27 }
 0x19c   :  { %v232_v28 = vld [vmem:[#allocation2 + $0x8] sm:$0xff] }
 0x19d   :  { %234 = vst.msk [vmem:[#allocation3 + $0x8] sm:$0xff] %vm32_vm0, %v232_v28 }
 0x19e   :  { %v231_v29 = vld [vmem:[#allocation2] sm:$0xff] }
 0x19f   :  { %233 = vst.msk [vmem:[#allocation3] sm:$0xff] %vm32_vm0, %v231_v29 }
 0x1a0   :  { %317 = shalt.err (!%p314_p4)
}
 0x1a1   :  { %s329_s23 = smov 128   ;;  %s330_s24 = smov 8  }
 0x1a2   :  { %246 = dma.vmem_to_hbm [thread:$0]  %s241_s3, 256, %s425_s5, [#allocation4], %s329_s23, %s329_s23, %s330_s24  }
 0x1a3   :  { %326 = dma.done.wait [#allocation4], 256  }
 0x1a4   :  { %327 = vsyncadd [#allocation4], 4294967040 }
 0x1a5   :  { %250 = vsyncpa [#allocation4], 1 }

</bundles_post_ra>
